<compile_context>
chip_gen: v7x
topology: tpu7x:2x2x1
jax: 0.10.0
libtpu: 0.0.40
codegen_flags: <defaults>
</compile_context>

<pallas_src>
import functools

import jax
import jax.numpy as jnp
from jax.experimental import pallas as pl
from jax.experimental.pallas import tpu as pltpu


def affine_coupling_kernel(*refs, n_linear, i1, i2):
    """refs = (ldj_in, xT, w0, b0, ..., w_{n-1}, b_{n-1}, yT_out, ldj_out).

    xT / yT blocks have shape (2, D, TL): slab k holds x[:, k::2] transposed so that
    the batch tile (TL) is on the lane axis.  i1 selects the conditioning half
    (passed through), i2 the transformed half.
    Weights are pre-transposed to (out, in) so every matmul is W @ h with N = TL
    lane-dense; weights may be bf16, accumulation is f32.
    """
    ldj_ref = refs[0]
    x_ref = refs[1]
    param_refs = refs[2:2 + 2 * n_linear]
    y_ref = refs[2 + 2 * n_linear]
    ldj_out_ref = refs[3 + 2 * n_linear]

    x1 = x_ref[i1]                 # (D, TL) f32, conditioning half (= y1)
    x2 = x_ref[i2]                 # (D, TL) f32, transformed half

    h = x1
    for i in range(n_linear):
        w = param_refs[2 * i][...]          # (out, in), bf16 (or f32)
        b = param_refs[2 * i + 1][...]      # (out, 1), f32 — broadcasts over lanes
        h = jnp.dot(w, h.astype(w.dtype),
                    preferred_element_type=jnp.float32) + b
        if i < n_linear - 1:
            h = jnp.maximum(h, 0.0)         # ReLU on all but the last layer (f32)
    t = h                                   # (D, TL) f32
    s = jnp.tanh(t)                         # EUP

    y_ref[i1] = x1                          # pass-through half
    y_ref[i2] = jnp.exp(s) * x2 + t         # affine-transformed half
    # log-det update fused in: sublane (XLU) reduction -> lane-dense (1, TL) store.
    ldj_out_ref[...] = ldj_ref[...] + jnp.sum(s, axis=0, keepdims=True)


def affine_coupling_forward(x, log_det_J, params, mask_config,
                            *, lane_tile=256, matmul_dtype=jnp.bfloat16):
    """Forward pass (reverse=False) matching the PyTorch AffineCoupling semantics.

    Args:
      x:          (L, W) float32.
      log_det_J:  (L,)   float32.
      params:     list of (W, b) with W stored (in, out), b (out,)  [torch Linear init].
      mask_config: 1 -> transform even units (condition on odd), 0 -> the opposite.
      lane_tile:  batch tile on the lane axis (grid over L when L > lane_tile).
      matmul_dtype: dtype of the MXU operands (bf16 recommended on v6e/v7x).
    Returns:
      (y, log_det_J_new) with y of shape (L, W).
    """
    L, W = x.shape
    D = W // 2
    n_linear = len(params)
    i1 = 1 if mask_config else 0          # conditioning half index in the (…,2) layout
    i2 = 1 - i1                           # transformed half index

    # Fused de-interleave + lane-dense transpose: xT[k, d, l] = x[l, 2*d + k].
    xT = jnp.transpose(x.reshape(L, D, 2), (2, 1, 0)).astype(jnp.float32)
    ldj_row = log_det_J.reshape(1, L).astype(jnp.float32)

    if L > lane_tile:
        TL = lane_tile
        Lp = ((L + TL - 1) // TL) * TL
    else:
        TL = L                             # single full-extent lane block
        Lp = L
    if Lp != L:
        xT = jnp.pad(xT, ((0, 0), (0, 0), (0, Lp - L)))
        ldj_row = jnp.pad(ldj_row, ((0, 0), (0, Lp - L)))

    # Pre-transpose weights to (out, in); cast to matmul dtype. Biases stay f32 (out, 1).
    flat_params = []
    for w, b in params:
        flat_params.append(jnp.asarray(w).T.astype(matmul_dtype))
        flat_params.append(jnp.asarray(b).reshape(-1, 1).astype(jnp.float32))

    # Parameters: full-array blocks with constant index_map -> resident across grid steps.
    param_specs = [pl.BlockSpec(p.shape, lambda i: (0, 0)) for p in flat_params]

    kernel = functools.partial(affine_coupling_kernel,
                               n_linear=n_linear, i1=i1, i2=i2)

    yT, ldj_out = pl.pallas_call(
        kernel,
        grid=(Lp // TL,),
        in_specs=[
            pl.BlockSpec((1, TL), lambda i: (0, i)),        # log_det_J tile
            pl.BlockSpec((2, D, TL), lambda i: (0, 0, i)),  # x tile (both halves)
            *param_specs,
        ],
        out_specs=(
            pl.BlockSpec((2, D, TL), lambda i: (0, 0, i)),  # y tile (both halves)
            pl.BlockSpec((1, TL), lambda i: (0, i)),        # updated log_det_J tile
        ),
        out_shape=(
            jax.ShapeDtypeStruct((2, D, Lp), jnp.float32),
            jax.ShapeDtypeStruct((1, Lp), jnp.float32),
        ),
        compiler_params=pltpu.CompilerParams(
            dimension_semantics=("parallel",),            # batch tiles are independent
            vmem_limit_bytes=48 * 1024 * 1024,            # safe under v7x's 64 MiB VMEM
        ),
    )(ldj_row, xT, *flat_params)

    # Re-interleave + un-transpose (single layout pass), drop batch padding.
    y = jnp.transpose(yT[:, :, :L], (2, 1, 0)).reshape(L, W)
    return y, ldj_out[0, :L]


def _reference_forward(x, log_det_J, params, mask_config, matmul_dtype=jnp.float32):
    """Pure-JAX reference matching the PyTorch module (reverse=False).

    matmul_dtype lets the reference mimic the kernel's bf16 MXU operands exactly.
    """
    L, W = x.shape
    D = W // 2
    x3 = x.reshape(L, D, 2)
    if mask_config:
        xI1, xI2 = x3[:, :, 1], x3[:, :, 0]
    else:
        xI1, xI2 = x3[:, :, 0], x3[:, :, 1]
    h = xI1
    for i, (w, b) in enumerate(params):
        h = jnp.dot(h.astype(matmul_dtype), w.astype(matmul_dtype),
                    preferred_element_type=jnp.float32) + b
        if i < len(params) - 1:
            h = jnp.maximum(h, 0.0)
    t = h
    s = jnp.tanh(t)
    y2 = jnp.exp(s) * xI2 + t
    y1 = xI1
    if mask_config:
        y = jnp.stack((y2, y1), axis=2)
    else:
        y = jnp.stack((y1, y2), axis=2)
    return y.reshape(L, W), log_det_J + jnp.sum(s, axis=1)


def init_params(key, in_out_dim, mid_dim, hidden):
    """nn.Linear-style init: U(-1/sqrt(fan_in), 1/sqrt(fan_in)); W stored (in, out)."""
    D = in_out_dim // 2
    layer_dims = [(D, mid_dim)] + [(mid_dim, mid_dim)] * (hidden - 1) + [(mid_dim, D)]
    params = []
    for (fan_in, fan_out) in layer_dims:
        key, kw, kb = jax.random.split(key, 3)
        bound = 1.0 / jnp.sqrt(fan_in)
        w = jax.random.uniform(kw, (fan_in, fan_out), jnp.float32, -bound, bound)
        b = jax.random.uniform(kb, (fan_out,), jnp.float32, -bound, bound)
        params.append((w, b))
    return params


if __name__ == "__main__":
    # Shapes consistent with the module: batch L=8, in_out_dim W=32, mid_dim=32,
    # hidden=3 hidden layers, mask_config=1.
    L, W = 8, 32
    mid_dim, hidden, mask_config = 32, 3, 1

    key = jax.random.PRNGKey(0)
    kx, kld, kp = jax.random.split(key, 3)
    x = jax.random.normal(kx, (L, W), jnp.float32)
    log_det_J = jax.random.normal(kld, (L,), jnp.float32)
    params = init_params(kp, W, mid_dim, hidden)

    y, ldj = affine_coupling_forward(x, log_det_J, params, mask_config)
    y = jax.block_until_ready(y)
    ldj = jax.block_until_ready(ldj)
    assert y.shape == (L, W) and ldj.shape == (L,)

    # Tight check against a reference that uses the same bf16 matmul operands.
    y_ref, ldj_ref = _reference_forward(x, log_det_J, params, mask_config,
                                        matmul_dtype=jnp.bfloat16)
    assert jnp.allclose(y, y_ref, atol=2e-3, rtol=2e-3)
    assert jnp.allclose(ldj, ldj_ref, atol=2e-3, rtol=2e-3)

    # Loose check against the exact f32 reference (bounds bf16 quantization error).
    y_f32, ldj_f32 = _reference_forward(x, log_det_J, params, mask_config)
    assert jnp.allclose(y, y_f32, atol=1e-1, rtol=1e-1)
    assert jnp.allclose(ldj, ldj_f32, atol=1e-1, rtol=1e-1)

    # Exercise the grid/tiling/padding path (L > lane_tile, not a multiple) and
    # the other mask_config.
    L2 = 200
    kx2, kld2 = jax.random.split(jax.random.PRNGKey(1))
    x_big = jax.random.normal(kx2, (L2, W), jnp.float32)
    ldj_big = jax.random.normal(kld2, (L2,), jnp.float32)
    y_big, ldj_big_out = affine_coupling_forward(x_big, ldj_big, params,
                                                 mask_config=0, lane_tile=128)
    y_big = jax.block_until_ready(y_big)
    ldj_big_out = jax.block_until_ready(ldj_big_out)
    y_big_ref, ldj_big_ref = _reference_forward(x_big, ldj_big, params, 0,
                                                matmul_dtype=jnp.bfloat16)
    assert y_big.shape == (L2, W) and ldj_big_out.shape == (L2,)
    assert jnp.allclose(y_big, y_big_ref, atol=2e-3, rtol=2e-3)
    assert jnp.allclose(ldj_big_out, ldj_big_ref, atol=2e-3, rtol=2e-3)

    print("KERNEL_OK")
</pallas_src>

<mosaic_0001>
module attributes {stable_mosaic.version = 11 : i64} {
  func.func @affine_coupling_kernel(%arg0: i32, %arg1: memref<1x8xf32, #tpu.memory_space<vmem>>, %arg2: memref<2x16x8xf32, #tpu.memory_space<vmem>>, %arg3: memref<32x16xbf16, #tpu.memory_space<vmem>>, %arg4: memref<32x1xf32, #tpu.memory_space<vmem>>, %arg5: memref<32x32xbf16, #tpu.memory_space<vmem>>, %arg6: memref<32x1xf32, #tpu.memory_space<vmem>>, %arg7: memref<32x32xbf16, #tpu.memory_space<vmem>>, %arg8: memref<32x1xf32, #tpu.memory_space<vmem>>, %arg9: memref<16x32xbf16, #tpu.memory_space<vmem>>, %arg10: memref<16x1xf32, #tpu.memory_space<vmem>>, %arg11: memref<2x16x8xf32, #tpu.memory_space<vmem>>, %arg12: memref<1x8xf32, #tpu.memory_space<vmem>>) attributes {dimension_semantics = [#tpu.dimension_semantics<parallel>], iteration_bounds = array<i64: 1>, scalar_prefetch = 0 : i64, scratch_operands = 0 : i64, tpu.core_type = #tpu.core_type<tc>, window_params = [{transform_indices = @transform_0, window_bounds = array<i64: 1, 8>}, {transform_indices = @transform_1, window_bounds = array<i64: 2, 16, 8>}, {pipeline_mode = #tpu.pipeline_mode<synchronous>, transform_indices = @transform_2, window_bounds = array<i64: 32, 16>}, {pipeline_mode = #tpu.pipeline_mode<synchronous>, transform_indices = @transform_3, window_bounds = array<i64: 32, 1>}, {pipeline_mode = #tpu.pipeline_mode<synchronous>, transform_indices = @transform_4, window_bounds = array<i64: 32, 32>}, {pipeline_mode = #tpu.pipeline_mode<synchronous>, transform_indices = @transform_5, window_bounds = array<i64: 32, 1>}, {pipeline_mode = #tpu.pipeline_mode<synchronous>, transform_indices = @transform_6, window_bounds = array<i64: 32, 32>}, {pipeline_mode = #tpu.pipeline_mode<synchronous>, transform_indices = @transform_7, window_bounds = array<i64: 32, 1>}, {pipeline_mode = #tpu.pipeline_mode<synchronous>, transform_indices = @transform_8, window_bounds = array<i64: 16, 32>}, {pipeline_mode = #tpu.pipeline_mode<synchronous>, transform_indices = @transform_9, window_bounds = array<i64: 16, 1>}, {transform_indices = @transform_10, window_bounds = array<i64: 2, 16, 8>}, {transform_indices = @transform_11, window_bounds = array<i64: 1, 8>}]} {
    %c1 = arith.constant 1 : index
    %c0 = arith.constant 0 : index
    %c0_0 = arith.constant 0 : index
    %0 = vector.load %arg2[%c1, %c0, %c0_0] : memref<2x16x8xf32, #tpu.memory_space<vmem>>, vector<1x16x8xf32>
    %1 = vector.shape_cast %0 : vector<1x16x8xf32> to vector<16x8xf32>
    %c0_1 = arith.constant 0 : index
    %c0_2 = arith.constant 0 : index
    %c0_3 = arith.constant 0 : index
    %2 = vector.load %arg2[%c0_1, %c0_2, %c0_3] : memref<2x16x8xf32, #tpu.memory_space<vmem>>, vector<1x16x8xf32>
    %3 = vector.shape_cast %2 : vector<1x16x8xf32> to vector<16x8xf32>
    %c0_4 = arith.constant 0 : index
    %c0_5 = arith.constant 0 : index
    %4 = vector.load %arg3[%c0_4, %c0_5] : memref<32x16xbf16, #tpu.memory_space<vmem>>, vector<32x16xbf16>
    %c0_6 = arith.constant 0 : index
    %c0_7 = arith.constant 0 : index
    %5 = vector.load %arg4[%c0_6, %c0_7] : memref<32x1xf32, #tpu.memory_space<vmem>>, vector<32x1xf32>
    %6 = arith.truncf %1 : vector<16x8xf32> to vector<16x8xbf16>
    %cst = arith.constant dense<0.000000e+00> : vector<32x8xf32>
    %7 = tpu.matmul %4, %6, %cst {dimension_numbers = #tpu.dot_dimension_numbers<[1], [0], [0], [1], [0, 0, 1, 1], [], []>} : vector<32x16xbf16>, vector<16x8xbf16>, vector<32x8xf32> -> vector<32x8xf32>
    %8 = vector.broadcast %5 : vector<32x1xf32> to vector<32x8xf32>
    %9 = arith.addf %7, %8 : vector<32x8xf32>
    %cst_8 = arith.constant 0.000000e+00 : f32
    %10 = vector.broadcast %cst_8 : f32 to vector<32x8xf32>
    %11 = arith.maximumf %9, %10 : vector<32x8xf32>
    %c0_9 = arith.constant 0 : index
    %c0_10 = arith.constant 0 : index
    %12 = vector.load %arg5[%c0_9, %c0_10] : memref<32x32xbf16, #tpu.memory_space<vmem>>, vector<32x32xbf16>
    %c0_11 = arith.constant 0 : index
    %c0_12 = arith.constant 0 : index
    %13 = vector.load %arg6[%c0_11, %c0_12] : memref<32x1xf32, #tpu.memory_space<vmem>>, vector<32x1xf32>
    %14 = arith.truncf %11 : vector<32x8xf32> to vector<32x8xbf16>
    %cst_13 = arith.constant dense<0.000000e+00> : vector<32x8xf32>
    %15 = tpu.matmul %12, %14, %cst_13 {dimension_numbers = #tpu.dot_dimension_numbers<[1], [0], [0], [1], [0, 0, 1, 1], [], []>} : vector<32x32xbf16>, vector<32x8xbf16>, vector<32x8xf32> -> vector<32x8xf32>
    %16 = vector.broadcast %13 : vector<32x1xf32> to vector<32x8xf32>
    %17 = arith.addf %15, %16 : vector<32x8xf32>
    %cst_14 = arith.constant 0.000000e+00 : f32
    %18 = vector.broadcast %cst_14 : f32 to vector<32x8xf32>
    %19 = arith.maximumf %17, %18 : vector<32x8xf32>
    %c0_15 = arith.constant 0 : index
    %c0_16 = arith.constant 0 : index
    %20 = vector.load %arg7[%c0_15, %c0_16] : memref<32x32xbf16, #tpu.memory_space<vmem>>, vector<32x32xbf16>
    %c0_17 = arith.constant 0 : index
    %c0_18 = arith.constant 0 : index
    %21 = vector.load %arg8[%c0_17, %c0_18] : memref<32x1xf32, #tpu.memory_space<vmem>>, vector<32x1xf32>
    %22 = arith.truncf %19 : vector<32x8xf32> to vector<32x8xbf16>
    %cst_19 = arith.constant dense<0.000000e+00> : vector<32x8xf32>
    %23 = tpu.matmul %20, %22, %cst_19 {dimension_numbers = #tpu.dot_dimension_numbers<[1], [0], [0], [1], [0, 0, 1, 1], [], []>} : vector<32x32xbf16>, vector<32x8xbf16>, vector<32x8xf32> -> vector<32x8xf32>
    %24 = vector.broadcast %21 : vector<32x1xf32> to vector<32x8xf32>
    %25 = arith.addf %23, %24 : vector<32x8xf32>
    %cst_20 = arith.constant 0.000000e+00 : f32
    %26 = vector.broadcast %cst_20 : f32 to vector<32x8xf32>
    %27 = arith.maximumf %25, %26 : vector<32x8xf32>
    %c0_21 = arith.constant 0 : index
    %c0_22 = arith.constant 0 : index
    %28 = vector.load %arg9[%c0_21, %c0_22] : memref<16x32xbf16, #tpu.memory_space<vmem>>, vector<16x32xbf16>
    %c0_23 = arith.constant 0 : index
    %c0_24 = arith.constant 0 : index
    %29 = vector.load %arg10[%c0_23, %c0_24] : memref<16x1xf32, #tpu.memory_space<vmem>>, vector<16x1xf32>
    %30 = arith.truncf %27 : vector<32x8xf32> to vector<32x8xbf16>
    %cst_25 = arith.constant dense<0.000000e+00> : vector<16x8xf32>
    %31 = tpu.matmul %28, %30, %cst_25 {dimension_numbers = #tpu.dot_dimension_numbers<[1], [0], [0], [1], [0, 0, 1, 1], [], []>} : vector<16x32xbf16>, vector<32x8xbf16>, vector<16x8xf32> -> vector<16x8xf32>
    %32 = vector.broadcast %29 : vector<16x1xf32> to vector<16x8xf32>
    %33 = arith.addf %31, %32 : vector<16x8xf32>
    %34 = math.tanh %33 : vector<16x8xf32>
    %c1_26 = arith.constant 1 : index
    %c0_27 = arith.constant 0 : index
    %c0_28 = arith.constant 0 : index
    %35 = vector.load %arg11[%c1_26, %c0_27, %c0_28] : memref<2x16x8xf32, #tpu.memory_space<vmem>>, vector<1x16x8xf32>
    %36 = vector.shape_cast %35 : vector<1x16x8xf32> to vector<16x8xf32>
    %37 = vector.shape_cast %1 : vector<16x8xf32> to vector<1x16x8xf32>
    tpu.vector_store %arg11[%c1_26, %c0_27, %c0_28], %37 {strides = array<i32>} : memref<2x16x8xf32, #tpu.memory_space<vmem>>, vector<1x16x8xf32>,
    %38 = math.exp %34 : vector<16x8xf32>
    %39 = arith.mulf %38, %3 : vector<16x8xf32>
    %40 = arith.addf %39, %33 : vector<16x8xf32>
    %c0_29 = arith.constant 0 : index
    %c0_30 = arith.constant 0 : index
    %c0_31 = arith.constant 0 : index
    %41 = vector.load %arg11[%c0_29, %c0_30, %c0_31] : memref<2x16x8xf32, #tpu.memory_space<vmem>>, vector<1x16x8xf32>
    %42 = vector.shape_cast %41 : vector<1x16x8xf32> to vector<16x8xf32>
    %43 = vector.shape_cast %40 : vector<16x8xf32> to vector<1x16x8xf32>
    tpu.vector_store %arg11[%c0_29, %c0_30, %c0_31], %43 {strides = array<i32>} : memref<2x16x8xf32, #tpu.memory_space<vmem>>, vector<1x16x8xf32>,
    %c0_32 = arith.constant 0 : index
    %c0_33 = arith.constant 0 : index
    %44 = vector.load %arg1[%c0_32, %c0_33] : memref<1x8xf32, #tpu.memory_space<vmem>>, vector<1x8xf32>
    %cst_34 = arith.constant dense<0.000000e+00> : vector<8xf32>
    %45 = vector.multi_reduction <add>, %34, %cst_34 [0] : vector<16x8xf32> to vector<8xf32>
    %46 = vector.shape_cast %45 : vector<8xf32> to vector<1x8xf32>
    %47 = arith.addf %44, %46 : vector<1x8xf32>
    %c0_35 = arith.constant 0 : index
    %c0_36 = arith.constant 0 : index
    %48 = vector.load %arg12[%c0_35, %c0_36] : memref<1x8xf32, #tpu.memory_space<vmem>>, vector<1x8xf32>
    tpu.vector_store %arg12[%c0_35, %c0_36], %47 {strides = array<i32>} : memref<1x8xf32, #tpu.memory_space<vmem>>, vector<1x8xf32>,
    return
  }
  func.func @transform_0(%arg0: i32) -> (i32, i32) {
    %c0_i32 = arith.constant 0 : i32
    %c0_i32_0 = arith.constant 0 : i32
    return %c0_i32, %arg0 : i32, i32
  }
  func.func @transform_1(%arg0: i32) -> (i32, i32, i32) {
    %c0_i32 = arith.constant 0 : i32
    %c0_i32_0 = arith.constant 0 : i32
    %c0_i32_1 = arith.constant 0 : i32
    return %c0_i32, %c0_i32_0, %arg0 : i32, i32, i32
  }
  func.func @transform_2(%arg0: i32) -> (i32, i32) {
    %c0_i32 = arith.constant 0 : i32
    %c0_i32_0 = arith.constant 0 : i32
    %c0_i32_1 = arith.constant 0 : i32
    return %c0_i32, %c0_i32_0 : i32, i32
  }
  func.func @transform_3(%arg0: i32) -> (i32, i32) {
    %c0_i32 = arith.constant 0 : i32
    %c0_i32_0 = arith.constant 0 : i32
    %c0_i32_1 = arith.constant 0 : i32
    return %c0_i32, %c0_i32_0 : i32, i32
  }
  func.func @transform_4(%arg0: i32) -> (i32, i32) {
    %c0_i32 = arith.constant 0 : i32
    %c0_i32_0 = arith.constant 0 : i32
    %c0_i32_1 = arith.constant 0 : i32
    return %c0_i32, %c0_i32_0 : i32, i32
  }
  func.func @transform_5(%arg0: i32) -> (i32, i32) {
    %c0_i32 = arith.constant 0 : i32
    %c0_i32_0 = arith.constant 0 : i32
    %c0_i32_1 = arith.constant 0 : i32
    return %c0_i32, %c0_i32_0 : i32, i32
  }
  func.func @transform_6(%arg0: i32) -> (i32, i32) {
    %c0_i32 = arith.constant 0 : i32
    %c0_i32_0 = arith.constant 0 : i32
    %c0_i32_1 = arith.constant 0 : i32
    return %c0_i32, %c0_i32_0 : i32, i32
  }
  func.func @transform_7(%arg0: i32) -> (i32, i32) {
    %c0_i32 = arith.constant 0 : i32
    %c0_i32_0 = arith.constant 0 : i32
    %c0_i32_1 = arith.constant 0 : i32
    return %c0_i32, %c0_i32_0 : i32, i32
  }
  func.func @transform_8(%arg0: i32) -> (i32, i32) {
    %c0_i32 = arith.constant 0 : i32
    %c0_i32_0 = arith.constant 0 : i32
    %c0_i32_1 = arith.constant 0 : i32
    return %c0_i32, %c0_i32_0 : i32, i32
  }
  func.func @transform_9(%arg0: i32) -> (i32, i32) {
    %c0_i32 = arith.constant 0 : i32
    %c0_i32_0 = arith.constant 0 : i32
    %c0_i32_1 = arith.constant 0 : i32
    return %c0_i32, %c0_i32_0 : i32, i32
  }
  func.func @transform_10(%arg0: i32) -> (i32, i32, i32) {
    %c0_i32 = arith.constant 0 : i32
    %c0_i32_0 = arith.constant 0 : i32
    %c0_i32_1 = arith.constant 0 : i32
    return %c0_i32, %c0_i32_0, %arg0 : i32, i32, i32
  }
  func.func @transform_11(%arg0: i32) -> (i32, i32) {
    %c0_i32 = arith.constant 0 : i32
    %c0_i32_0 = arith.constant 0 : i32
    return %c0_i32, %arg0 : i32, i32
  }
}

</mosaic_0001>

<bundles_post_ra>
// kernel: tpu_custom_call.1
= control target key start
LH: loop header
LB: loop body
LE: loop exit
PB: predicated region body
PF: predicated region fallthrough
CT: control target
= control target key end

     0   :  { %vm410_vm0 = vcmask 64512   ;;  %vm83_vm1 = vcmask 130048   ;;  %v561_v4 = vmov 0   ;;  %s740_s0 = inlined_call_operand.vmem [shape: f32[1,8], index: 0, kind: input, shape index: {}]   ;;  %s741_s1 = inlined_call_operand.vmem [shape: f32[2,16,8], index: 1, kind: input, shape index: {}]   ;;  %s742_s2 = inlined_call_operand.vmem [shape: bf16[32,16], index: 2, kind: input, shape index: {}]   ;;  %s743_s3 = inlined_call_operand.vmem [shape: f32[32,1], index: 3, kind: input, shape index: {}]   ;;  %s744_s4 = inlined_call_operand.vmem [shape: bf16[32,32], index: 4, kind: input, shape index: {}]   ;;  %s745_s5 = inlined_call_operand.vmem [shape: f32[32,1], index: 5, kind: input, shape index: {}]   ;;  %s746_s6 = inlined_call_operand.vmem [shape: bf16[32,32], index: 6, kind: input, shape index: {}]   ;;  %s747_s7 = inlined_call_operand.vmem [shape: f32[32,1], index: 7, kind: input, shape index: {}]   ;;  %s748_s8 = inlined_call_operand.vmem [shape: bf16[16,32], index: 8, kind: input, shape index: {}]   ;;  %s749_s9 = inlined_call_operand.vmem [shape: f32[16,1], index: 9, kind: input, shape index: {}]   ;;  %s750_s10 = inlined_call_operand.vmem [shape: f32[2,16,8], index: 10, kind: output, shape index: {0}]   ;;  %s751_s11 = inlined_call_operand.hbm [shape: f32[1,8], index: 11, kind: output, shape index: {1}]  }
   0x1   :  { %v454_v0 = vld [vmem:[%s741_s1 + $0x10] sm:$0xff]  ;;  %v455_v1 = vld [vmem:[%s741_s1 + $0x18] sm:$0xff]  ;;  %v522_v3 = vld [vmem:[%s742_s2] sm:$0xff]   ;;  %520 = vset.pattern.permute.xlu0 %v561_v4  ;;  %521 = vset.pattern.permute.xlu1 %v561_v4 }
   0x2   :  { %v52_v2 = vpack.c.bf16 %v455_v1, %v454_v0  ;;  %470 = vst.msk [vmem:[%s750_s10 + $0x10] sm:$0xff] %vm410_vm0, %v454_v0  ;;  %471 = vst.msk [vmem:[%s750_s10 + $0x18] sm:$0xff] %vm410_vm0, %v455_v1  ;;  %v48_v5 = vld [vmem:[%s743_s3] sm:$0xff]  ;;  %488 = vmatprep.mubr.msk.bf16.mxu0 %vm83_vm1, %v522_v3  ;;  %v523_v6 = vld [vmem:[%s742_s2 + $0x8] sm:$0xff]  }
   0x3   :  { %v50_v7 = vld [vmem:[%s743_s3 + $0x10] sm:$0xff]  ;;  %55 = vperm.xlu0 %520, %v48_v5   ;;  %v49_v8 = vld [vmem:[%s743_s3 + $0x8] sm:$0xff]  ;;  %v51_v9 = vld [vmem:[%s743_s3 + $0x18] sm:$0xff] }
   0x4   :  { %486 = vmatprep.subr.bf16.mxu0 %v52_v2  ;;  %65 = vperm.xlu1 %521, %v50_v7   ;;  %v147_v10 = vld [vmem:[%s745_s5] sm:$0xff]  ;;  %v148_v11 = vld [vmem:[%s745_s5 + $0x8] sm:$0xff] }
   0x5   :  { %487 = vmatpush3.bf16.msra.mxu0 %v52_v2 }
   0x7   :  { %60 = vperm.xlu0 %520, %v49_v8  }
   0x8   :  { %489 = vmatmul.mubr.msk.bf16.vlgmr.msra.gmra.mrb[0].mxu0 %vm83_vm1, %v523_v6  ;;  %70 = vperm.xlu1 %521, %v51_v9  }
   0x9   :  { %17 = vsyncpa [#allocation3], 0  ;;  %v149_v12 = vld [vmem:[%s745_s5 + $0x10] sm:$0xff]  ;;  %v150_v13 = vld [vmem:[%s745_s5 + $0x18] sm:$0xff]  ;;  %vm183_vm2 = vcmask 261120   ;;  %v562_v60 = vmov 0.0  }
   0xa   :  { %v247_v14 = vld [vmem:[%s747_s7] sm:$0xff]  ;;  %v248_v15 = vld [vmem:[%s747_s7 + $0x8] sm:$0xff]  ;;  %v249_v16 = vld [vmem:[%s747_s7 + $0x10] sm:$0xff]  ;;  %vm563_vm3 = vmmov 0   ;;  %s564_s25 = smov [#allocation2]   ;;  %vm434_vm4 = vcmask 57344  }
   0xb   :  { %155 = vperm.xlu0 %520, %v147_v10   ;;  %v250_v17 = vld [vmem:[%s747_s7 + $0x18] sm:$0xff]  ;;  %v344_v18 = vld [vmem:[%s749_s9] sm:$0xff]  ;;  %v345_v19 = vld [vmem:[%s749_s9 + $0x8] sm:$0xff]  ;;  %s444_s26 = sshll.u32 %s564_s25, 4  ;;  %s445_s26 = int_to_ptr.vmem [resolvable:$true] %s444_s26 }
   0xc   :  { %160 = vperm.xlu1 %521, %v148_v11   ;;  %v524_v20 = vld [vmem:[%s744_s4] sm:$0xff]   ;;  %v525_v39 = vld [vmem:[%s744_s4 + $0x8] sm:$0xff]   ;;  %s541_s30 = scalar_lea.vmem %s445_s26, 32  ;;  %p542_p1 = scmp.lt.s32.totalorder %s445_s26, %s445_s26 }
   0xd   :  { %496 = vmatprep.mubr.msk.bf16.mxu1 %vm183_vm2, %v524_v20  ;;  %v526_v40 = vld [vmem:[%s746_s6] sm:$0xff]   ;;  %v527_v59 = vld [vmem:[%s746_s6 + $0x8] sm:$0xff]  }
   0xe   :  { %504 = vmatprep.mubr.msk.bf16.mxu0 %vm183_vm2, %v526_v40 }
   0xf   :  { %165 = vperm.xlu0 %520, %v149_v12  }
  0x10   :  { %170 = vperm.xlu1 %521, %v150_v13  }
  0x13   :  { %255 = vperm.xlu0 %520, %v247_v14  }
  0x14   :  { %260 = vperm.xlu1 %521, %v248_v15   ;;  %v528_v15 = vld [vmem:[%s748_s8] sm:$0xff]  }
  0x17   :  { %265 = vperm.xlu0 %520, %v249_v16  }
  0x18   :  { %270 = vperm.xlu1 %521, %v250_v17  }
  0x1b   :  { %350 = vperm.xlu0 %520, %v344_v18  }
  0x1c   :  { %355 = vperm.xlu1 %521, %v345_v19  }
  0x82   :  { %v56_v22 = vpop.permute.xlu0 %55 }
  0x83   :  { %v66_v21 = vpop.permute.xlu1 %65 }
  0x86   :  { %v61_v29 = vpop.permute.xlu0 %60 }
  0x87   :  { %v71_v26 = vpop.permute.xlu1 %70 }
  0x8a   :  { %v156_v41 = vpop.permute.xlu0 %155 }
  0x8b   :  { %v161_v42 = vpop.permute.xlu1 %160 }
  0x8e   :  { %v166_v43 = vpop.permute.xlu0 %165 }
  0x8f   :  { %v171_v47 = vpop.permute.xlu1 %170 }
  0x92   :  { %v256_v61 = vpop.permute.xlu0 %255 }
  0x93   :  { %v261_v62 = vpop.permute.xlu1 %260 }
  0x96   :  { %v266_v63 = vpop.permute.xlu0 %265 }
  0x97   :  { %v271_v3 = vpop.permute.xlu1 %270 }
  0x9a   :  { %v351_v16 = vpop.permute.xlu0 %350 }
  0x9b   :  { %v356_v20 = vpop.permute.xlu1 %355 }
  0xdb   :  { %v490_v23 = vpop.f32.mrb[0].mxu0 }
  0xdc   :  { %v133_v24 = vadd.f32 %v490_v23, %v66_v21  ;;  %v124_v25 = vpop.f32.mrb[1].mxu0 }
  0xdd   :  { %v125_v27 = vadd.f32 %v124_v25, %v56_v22  ;;  %v491_v28 = vpop.f32.mrb[2].mxu0 }
  0xde   :  { %v136_v30 = vadd.f32 %v491_v28, %v71_v26  ;;  %v127_v31 = vpop.f32.mrb[3].mxu0  ;;  %v141_v33 = vmax.f32 %v133_v24, 0.0 }
  0xdf   :  { %v128_v32 = vadd.f32 %v127_v31, %v61_v29  ;;  %v139_v35 = vmax.f32 %v125_v27, 0.0 }
  0xe0   :  { %v142_v34 = vmax.f32 %v136_v30, 0.0 }
  0xe1   :  { %v140_v36 = vmax.f32 %v128_v32, 0.0 }
  0xe2   :  { %v152_v37 = vpack.c.bf16 %v142_v34, %v141_v33  ;;  %v42_v34 = vld [vmem:[%s741_s1] sm:$0xff] }
  0xe3   :  { %v151_v38 = vpack.c.bf16 %v140_v36, %v139_v35 }
  0xe5   :  { %492 = vmatprep.subr.bf16.mxu1 %v151_v38 }
  0xe6   :  { %493 = vmatpush3.bf16.msra.mxu1 %v151_v38 }
  0xe7   :  { %494 = vmatprep.subr.bf16.mxu1 %v152_v37 }
  0xea   :  { %495 = vmatpush3.bf16.msra.mxu1 %v152_v37  ;;  %v43_v37 = vld [vmem:[%s741_s1 + $0x8] sm:$0xff] }
  0xeb   :  { %508 = vmatprep.subr.bf16.mxu1 %v562_v60 }
  0xed   :  { %497 = vmatmul.mubr.msk.bf16.vlgmr.msra.gmra.mrb[0].mxu1 %vm183_vm2, %v525_v39 }
  0xee   :  { %512 = vmatprep.mubr.msk.bf16.mxu1 %vm563_vm3, %v562_v60 }
 0x1c0   :  { %v498_v44 = vpop.f32.mrb[0].mxu1 }
 0x1c1   :  { %v233_v45 = vadd.f32 %v498_v44, %v166_v43  ;;  %v224_v46 = vpop.f32.mrb[1].mxu1 }
 0x1c2   :  { %v225_v48 = vadd.f32 %v224_v46, %v156_v41  ;;  %v499_v49 = vpop.f32.mrb[2].mxu1  ;;  %v423_v41 = vld [vmem:[%s740_s0] sm:$0x1]  ;;  %s537_s0 = scalar_lea.vmem %s445_s26, 16 }
 0x1c3   :  { %v236_v50 = vadd.f32 %v499_v49, %v171_v47  ;;  %v227_v51 = vpop.f32.mrb[3].mxu1  ;;  %v241_v53 = vmax.f32 %v233_v45, 0.0  ;;  %p538_p0 = scmp.ne.s32.totalorder %s445_s26, %s537_s0  ;;  %p543_p2 = scmp.lt.s32.totalorder %s541_s30, %s537_s0 }
 0x1c4   :  { %v228_v52 = vadd.f32 %v227_v51, %v161_v42  ;;  %v239_v55 = vmax.f32 %v225_v48, 0.0 }
 0x1c5   :  { %v242_v54 = vmax.f32 %v236_v50, 0.0  ;;  %p544_p3 = por %p543_p2, %p542_p1 }
 0x1c6   :  { %v240_v56 = vmax.f32 %v228_v52, 0.0 }
 0x1c7   :  { %v252_v57 = vpack.c.bf16 %v242_v54, %v241_v53  ;;  %p545_p4 = pnand %p544_p3, %p538_p0 }
 0x1c8   :  { %v251_v58 = vpack.c.bf16 %v240_v56, %v239_v55 }
 0x1ca   :  { %500 = vmatprep.subr.bf16.mxu0 %v251_v58 }
 0x1cb   :  { %501 = vmatpush3.bf16.msra.mxu0 %v251_v58 }
 0x1cc   :  { %502 = vmatprep.subr.bf16.mxu0 %v252_v57 }
 0x1cf   :  { %503 = vmatpush3.bf16.msra.mxu0 %v252_v57 }
 0x1d2   :  { %505 = vmatmul.mubr.msk.bf16.vlgmr.msra.gmra.mrb[4].mxu0 %vm183_vm2, %v527_v59 }
 0x2a5   :  { %v506_v0 = vpop.f32.mrb[4].mxu0 }
 0x2a6   :  { %v332_v1 = vadd.f32 %v506_v0, %v266_v63  ;;  %v323_v2 = vpop.f32.mrb[5].mxu0 }
 0x2a7   :  { %v324_v4 = vadd.f32 %v323_v2, %v256_v61  ;;  %v507_v5 = vpop.f32.mrb[6].mxu0 }
 0x2a8   :  { %v335_v6 = vadd.f32 %v507_v5, %v271_v3  ;;  %v326_v7 = vpop.f32.mrb[7].mxu0  ;;  %v340_v9 = vmax.f32 %v332_v1, 0.0 }
 0x2a9   :  { %v327_v8 = vadd.f32 %v326_v7, %v261_v62  ;;  %v338_v11 = vmax.f32 %v324_v4, 0.0 }
 0x2aa   :  { %v341_v10 = vmax.f32 %v335_v6, 0.0 }
 0x2ab   :  { %v339_v12 = vmax.f32 %v327_v8, 0.0 }
 0x2ac   :  { %v347_v13 = vpack.c.bf16 %v341_v10, %v340_v9 }
 0x2ad   :  { %v346_v14 = vpack.c.bf16 %v339_v12, %v338_v11 }
 0x2af   :  { %509 = vmatpush3.bf16.msra.mxu1 %v346_v14 }
 0x2b0   :  { %510 = vmatprep.subr.bf16.mxu1 %v562_v60 }
 0x2b3   :  { %511 = vmatpush3.bf16.msra.mxu1 %v347_v13 }
 0x2b6   :  { %513 = vmatmul.mubr.msk.bf16.vlgmr.msra.gmra.mrb[4].mxu1 %vm183_vm2, %v528_v15 }
 0x389   :  { %v400_v17 = vpop.f32.mrb[4].mxu1 }
 0x38a   :  { %v401_v18 = vadd.f32 %v400_v17, %v351_v16  ;;  %v514_v19 = vpop.f32.mrb[5].mxu1 }
 0x38b   :  { %v403_v21 = vpop.f32.mrb[6].mxu1 }
 0x38c   :  { %529 = vtanh.f32 %v401_v18  ;;  %v404_v22 = vadd.f32 %v403_v21, %v356_v20  ;;  %v515_v23 = vpop.f32.mrb[7].mxu1 }
 0x38e   :  { %531 = vtanh.f32 %v404_v22 }
 0x396   :  { %v530_v24 = vpop.eup %529 }
 0x397   :  { %v413_v25 = vmul.f32 1.442695, %v530_v24  ;;  %v424_v28 = vsel %vm410_vm0, %v530_v24, 0.0 }
 0x398   :  { %v532_v26 = vpop.eup %531 }
 0x399   :  { %533 = vpow2.f32 %v413_v25  ;;  %v415_v27 = vmul.f32 1.442695, %v532_v26  ;;  %v425_v29 = vsel %vm410_vm0, %v532_v26, 0.0 }
 0x39a   :  { %v426_v30 = vadd.f32 %v425_v29, %v424_v28 }
 0x39b   :  { %535 = vpow2.f32 %v415_v27 }
 0x39c   :  { %v427_v31 = vrot.slane %v426_v30, 4 }
 0x39e   :  { %v428_v32 = vadd.f32 %v427_v31, %v426_v30 }
 0x3a0   :  { %v429_v33 = vrot.slane %v428_v32, 2 }
 0x3a2   :  { %v430_v35 = vadd.f32 %v429_v33, %v428_v32 }
 0x3a3   :  { %v534_v36 = vpop.eup %533 }
 0x3a4   :  { %v417_v38 = vmul.f32 %v534_v36, %v42_v34  ;;  %v431_v39 = vrot.slane %v430_v35, 1 }
 0x3a5   :  { %v536_v40 = vpop.eup %535 }
 0x3a6   :  { %v419_v42 = vadd.f32 %v417_v38, %v401_v18  ;;  %v418_v43 = vmul.f32 %v536_v40, %v43_v37  ;;  %v432_v44 = vadd.f32 %v431_v39, %v430_v35 }
 0x3a8   :  { %421 = vst.msk [vmem:[%s750_s10] sm:$0xff] %vm410_vm0, %v419_v42  ;;  %v420_v45 = vadd.f32 %v418_v43, %v404_v22  ;;  %v433_v46 = vadd.f32 %v432_v44, %v423_v41 }
 0x3aa   :  { %422 = vst.msk [vmem:[%s750_s10 + $0x8] sm:$0xff] %vm410_vm0, %v420_v45 }
 0x3ab   :  { %435 = vst.msk [vmem:[#allocation2] sm:$0x1] %vm434_vm4, %v433_v46 }
 0x3ac   :  { %548 = shalt.err (!%p545_p4)
}
 0x3ad   :  { %s549_s13 = scalar_lea.hbm %s751_s11, 16 }
 0x3ae   :  { %p550_p5 = scmp.ne.s32.totalorder %s751_s11, %s549_s13  ;;  %p553_p6 = scmp.lt.u32.totalorder %s549_s13, %s751_s11 }
 0x3b0   :  { %p555_p7 = pnand %p553_p6, %p550_p5 }
 0x3b2   :  { %558 = shalt.err (!%p555_p7)
}
 0x3b3   :  { %447 = dma.vmem_to_hbm [thread:$0]  %s445_s26, 16, %s751_s11, [#allocation3]  }
 0x3b4   :  { %559 = dma.done.wait [#allocation3], 16  }
 0x3b5   :  { %560 = vsyncadd [#allocation3], 4294967280 }
 0x3b6   :  { %453 = vsyncpa [#allocation3], 1 }

</bundles_post_ra>
